<compile_context>
chip_gen: v7x
topology: tpu7x:2x2x1
jax: 0.10.0
libtpu: 0.0.40
codegen_flags: <defaults>
</compile_context>

<pallas_src>
import numpy as np

import jax
import jax.numpy as jnp
from jax.experimental import pallas as pl
from jax.experimental.pallas import tpu as pltpu

# B3-spline filter taps (fixed, non-trainable in the torch module).
W5 = (1.0 / 16.0, 1.0 / 4.0, 3.0 / 8.0, 1.0 / 4.0, 1.0 / 16.0)


def _reflect_conv_matrix(n: int, dilation: int) -> np.ndarray:
    """(n, n) matrix M with (M @ x)[i] == dilated 5-tap B3 conv of x at i, torch 'reflect' padded."""
    m = np.zeros((n, n), dtype=np.float64)
    for i in range(n):
        for k in range(5):
            t = i + (k - 2) * dilation
            if t < 0:
                t = -t                      # reflect without edge repeat (torch 'reflect')
            elif t >= n:
                t = 2 * (n - 1) - t
            m[i, t] += W5[k]
    return m


def _build_conv_matrices(h, w, hp, wp, level):
    """Per-level conv matrices, zero-extended to the padded (hp, wp) sizes."""
    a = np.zeros((level, hp, hp), dtype=np.float32)
    b = np.zeros((level, wp, wp), dtype=np.float32)
    for j in range(level):
        d = 2 ** j
        a[j, :h, :h] = _reflect_conv_matrix(h, d)        # row conv:   A_j @ x
        b[j, :w, :w] = _reflect_conv_matrix(w, d).T      # col conv:   x @ B_j
    return jnp.asarray(a), jnp.asarray(b)


def _split_f32(v):
    """Split f32 into a bf16-exact 'hi' part and the small residual 'lo' (both f32)."""
    hi = v.astype(jnp.bfloat16).astype(jnp.float32)
    return hi, v - hi


def _mm_f32(x, m, *, matrix_on_left):
    """f32 matmul against a bf16-exact constant matrix, robust to bf16 MXU contraction.

    The conv-matrix entries are exact in bf16, so splitting the other operand into hi+lo and
    accumulating two MXU passes in f32 keeps ~1e-5 accuracy regardless of the default f32
    contraction precision (and is exact up to rounding if the default is already fp32).
    """
    hi, lo = _split_f32(x)
    if matrix_on_left:
        return (jnp.dot(m, hi, preferred_element_type=jnp.float32)
                + jnp.dot(m, lo, preferred_element_type=jnp.float32))
    return (jnp.dot(hi, m, preferred_element_type=jnp.float32)
            + jnp.dot(lo, m, preferred_element_type=jnp.float32))


def _uwt_kernel(x_ref, a_ref, b_ref, o_ref):
    """One batch element: x (1,Hp,Wp), A (J,Hp,Hp), B (J,Wp,Wp) -> out (1,J+1,Hp,Wp)."""
    level = o_ref.shape[1] - 1
    y = x_ref[0]                                             # c_0
    for j in range(level):                                   # static unroll (level is small)
        prev = y                                             # c_j
        yh = _mm_f32(prev, a_ref[j], matrix_on_left=True)    # conv along H (sublane axis), MXU
        y = _mm_f32(yh, b_ref[j], matrix_on_left=False)      # conv along W (lane axis), MXU
        o_ref[0, j, :, :] = prev - y                         # w_{j+1} = c_j - c_{j+1}
    o_ref[0, level, :, :] = y                                # remaining smooth image c_J


def b3spline_uwt_approx2(x: jax.Array, level: int = 3) -> jax.Array:
    """UWT with B3 spline, separable 1D dilated convs, reflect padding.

    Args:
        x: (B, H, W) images.
    Returns:
        (B, level + 1, H, W) float32: [w_1, ..., w_J, c_J].
    """
    B, H, W = x.shape
    min_size = 2 * 2 ** (level - 1) + 1
    assert H >= min_size and W >= min_size, (
        f"reflect padding of the level-{level} UWT needs H, W >= {min_size}, got {(H, W)}")
    x = x.astype(jnp.float32)

    # Lane-dense layout: pad H to a multiple of 8 (sublane) and W to a multiple of 128 (lane).
    hp = ((H + 7) // 8) * 8
    wp = ((W + 127) // 128) * 128
    if (hp, wp) != (H, W):
        x = jnp.pad(x, ((0, 0), (0, hp - H), (0, wp - W)))

    a_mats, b_mats = _build_conv_matrices(H, W, hp, wp, level)

    # Size the scoped-VMEM request from the actual block footprint (double-buffered blocks,
    # resident constants, in-kernel f32 temporaries), with a floor at the common default.
    block_bytes = 4 * (
        2 * hp * wp                         # double-buffered input image block
        + 2 * (level + 1) * hp * wp         # double-buffered output block
        + 2 * level * (hp * hp + wp * wp)   # conv-matrix constants (counted x2, conservative)
        + 8 * hp * wp                       # prev / y / yh / hi / lo temporaries
    )
    vmem_limit = int(max(32 * 1024 * 1024, min(block_bytes * 5 // 4, 96 * 1024 * 1024)))

    out = pl.pallas_call(
        _uwt_kernel,
        out_shape=jax.ShapeDtypeStruct((B, level + 1, hp, wp), jnp.float32),
        grid=(B,),
        in_specs=[
            pl.BlockSpec((1, hp, wp), lambda b: (b, 0, 0)),
            pl.BlockSpec((level, hp, hp), lambda b: (0, 0, 0)),   # constant, stays resident
            pl.BlockSpec((level, wp, wp), lambda b: (0, 0, 0)),   # constant, stays resident
        ],
        out_specs=pl.BlockSpec((1, level + 1, hp, wp), lambda b: (b, 0, 0, 0)),
        compiler_params=pltpu.CompilerParams(
            dimension_semantics=("parallel",),
            vmem_limit_bytes=vmem_limit,
        ),
    )(x, a_mats, b_mats)

    if (hp, wp) != (H, W):
        out = out[:, :, :H, :W]
    return out


def _reference_uwt(x: jax.Array, level: int = 3) -> jax.Array:
    """Pure-JAX reference reproducing the torch module semantics (reflect pad, per level)."""
    B, H, W = x.shape
    y = x.astype(jnp.float32)
    outs = []
    for j in range(level):
        d = 2 ** j
        p = 2 * d
        prev = y
        pad_h = jnp.pad(prev, ((0, 0), (p, p), (0, 0)), mode="reflect")
        yh = sum(W5[k] * pad_h[:, k * d:k * d + H, :] for k in range(5))
        pad_w = jnp.pad(yh, ((0, 0), (0, 0), (p, p)), mode="reflect")
        y = sum(W5[k] * pad_w[:, :, k * d:k * d + W] for k in range(5))
        outs.append(prev - y)
    outs.append(y)
    return jnp.stack(outs, axis=1)


if __name__ == "__main__":
    key = jax.random.PRNGKey(0)
    B, H, W = 2, 16, 16
    x = jax.random.normal(key, (B, H, W), dtype=jnp.float32)

    out = jax.block_until_ready(b3spline_uwt_approx2(x, level=3))
    ref = _reference_uwt(x, level=3)

    assert out.shape == (B, 4, H, W), out.shape
    err = float(jnp.max(jnp.abs(out - ref)))
    assert err < 1e-3, err   # typical error ~1e-5 (hi/lo-split MXU passes); real bugs are O(0.1+)

    print("KERNEL_OK")
</pallas_src>

<mosaic_0001>
module attributes {stable_mosaic.version = 11 : i64} {
  func.func @_uwt_kernel(%arg0: i32, %arg1: memref<1x16x128xf32, #tpu.memory_space<vmem>>, %arg2: memref<3x16x16xf32, #tpu.memory_space<vmem>>, %arg3: memref<3x128x128xf32, #tpu.memory_space<vmem>>, %arg4: memref<1x4x16x128xf32, #tpu.memory_space<vmem>>) attributes {dimension_semantics = [#tpu.dimension_semantics<parallel>], iteration_bounds = array<i64: 2>, scalar_prefetch = 0 : i64, scratch_operands = 0 : i64, tpu.core_type = #tpu.core_type<tc>, window_params = [{transform_indices = @transform_0, window_bounds = array<i64: 1, 16, 128>}, {pipeline_mode = #tpu.pipeline_mode<synchronous>, transform_indices = @transform_1, window_bounds = array<i64: 3, 16, 16>}, {pipeline_mode = #tpu.pipeline_mode<synchronous>, transform_indices = @transform_2, window_bounds = array<i64: 3, 128, 128>}, {transform_indices = @transform_3, window_bounds = array<i64: 1, 4, 16, 128>}]} {
    %c0 = arith.constant 0 : index
    %c0_0 = arith.constant 0 : index
    %c0_1 = arith.constant 0 : index
    %0 = vector.load %arg1[%c0, %c0_0, %c0_1] : memref<1x16x128xf32, #tpu.memory_space<vmem>>, vector<1x16x128xf32>
    %1 = vector.shape_cast %0 : vector<1x16x128xf32> to vector<16x128xf32>
    %c0_2 = arith.constant 0 : index
    %c0_3 = arith.constant 0 : index
    %c0_4 = arith.constant 0 : index
    %2 = vector.load %arg2[%c0_2, %c0_3, %c0_4] : memref<3x16x16xf32, #tpu.memory_space<vmem>>, vector<1x16x16xf32>
    %3 = vector.shape_cast %2 : vector<1x16x16xf32> to vector<16x16xf32>
    %4 = arith.truncf %1 : vector<16x128xf32> to vector<16x128xbf16>
    %5 = arith.extf %4 : vector<16x128xbf16> to vector<16x128xf32>
    %6 = arith.subf %1, %5 : vector<16x128xf32>
    %cst = arith.constant dense<0.000000e+00> : vector<16x128xf32>
    %7 = tpu.matmul %3, %5, %cst {dimension_numbers = #tpu.dot_dimension_numbers<[1], [0], [0], [1], [0, 0, 1, 1], [], []>} : vector<16x16xf32>, vector<16x128xf32>, vector<16x128xf32> -> vector<16x128xf32>
    %cst_5 = arith.constant dense<0.000000e+00> : vector<16x128xf32>
    %8 = tpu.matmul %3, %6, %cst_5 {dimension_numbers = #tpu.dot_dimension_numbers<[1], [0], [0], [1], [0, 0, 1, 1], [], []>} : vector<16x16xf32>, vector<16x128xf32>, vector<16x128xf32> -> vector<16x128xf32>
    %9 = arith.addf %7, %8 : vector<16x128xf32>
    %c0_6 = arith.constant 0 : index
    %c0_7 = arith.constant 0 : index
    %c0_8 = arith.constant 0 : index
    %10 = vector.load %arg3[%c0_6, %c0_7, %c0_8] : memref<3x128x128xf32, #tpu.memory_space<vmem>>, vector<1x128x128xf32>
    %11 = vector.shape_cast %10 : vector<1x128x128xf32> to vector<128x128xf32>
    %12 = arith.truncf %9 : vector<16x128xf32> to vector<16x128xbf16>
    %13 = arith.extf %12 : vector<16x128xbf16> to vector<16x128xf32>
    %14 = arith.subf %9, %13 : vector<16x128xf32>
    %cst_9 = arith.constant dense<0.000000e+00> : vector<16x128xf32>
    %15 = tpu.matmul %13, %11, %cst_9 {dimension_numbers = #tpu.dot_dimension_numbers<[1], [0], [0], [1], [0, 0, 1, 1], [], []>} : vector<16x128xf32>, vector<128x128xf32>, vector<16x128xf32> -> vector<16x128xf32>
    %cst_10 = arith.constant dense<0.000000e+00> : vector<16x128xf32>
    %16 = tpu.matmul %14, %11, %cst_10 {dimension_numbers = #tpu.dot_dimension_numbers<[1], [0], [0], [1], [0, 0, 1, 1], [], []>} : vector<16x128xf32>, vector<128x128xf32>, vector<16x128xf32> -> vector<16x128xf32>
    %17 = arith.addf %15, %16 : vector<16x128xf32>
    %18 = arith.subf %1, %17 : vector<16x128xf32>
    %c0_11 = arith.constant 0 : index
    %c0_12 = arith.constant 0 : index
    %c0_13 = arith.constant 0 : index
    %c0_14 = arith.constant 0 : index
    %19 = vector.load %arg4[%c0_11, %c0_12, %c0_13, %c0_14] : memref<1x4x16x128xf32, #tpu.memory_space<vmem>>, vector<1x1x16x128xf32>
    %20 = vector.shape_cast %19 : vector<1x1x16x128xf32> to vector<16x128xf32>
    %21 = vector.shape_cast %18 : vector<16x128xf32> to vector<1x1x16x128xf32>
    tpu.vector_store %arg4[%c0_11, %c0_12, %c0_13, %c0_14], %21 {strides = array<i32>} : memref<1x4x16x128xf32, #tpu.memory_space<vmem>>, vector<1x1x16x128xf32>,
    %c1 = arith.constant 1 : index
    %c0_15 = arith.constant 0 : index
    %c0_16 = arith.constant 0 : index
    %22 = vector.load %arg2[%c1, %c0_15, %c0_16] : memref<3x16x16xf32, #tpu.memory_space<vmem>>, vector<1x16x16xf32>
    %23 = vector.shape_cast %22 : vector<1x16x16xf32> to vector<16x16xf32>
    %24 = arith.truncf %17 : vector<16x128xf32> to vector<16x128xbf16>
    %25 = arith.extf %24 : vector<16x128xbf16> to vector<16x128xf32>
    %26 = arith.subf %17, %25 : vector<16x128xf32>
    %cst_17 = arith.constant dense<0.000000e+00> : vector<16x128xf32>
    %27 = tpu.matmul %23, %25, %cst_17 {dimension_numbers = #tpu.dot_dimension_numbers<[1], [0], [0], [1], [0, 0, 1, 1], [], []>} : vector<16x16xf32>, vector<16x128xf32>, vector<16x128xf32> -> vector<16x128xf32>
    %cst_18 = arith.constant dense<0.000000e+00> : vector<16x128xf32>
    %28 = tpu.matmul %23, %26, %cst_18 {dimension_numbers = #tpu.dot_dimension_numbers<[1], [0], [0], [1], [0, 0, 1, 1], [], []>} : vector<16x16xf32>, vector<16x128xf32>, vector<16x128xf32> -> vector<16x128xf32>
    %29 = arith.addf %27, %28 : vector<16x128xf32>
    %c1_19 = arith.constant 1 : index
    %c0_20 = arith.constant 0 : index
    %c0_21 = arith.constant 0 : index
    %30 = vector.load %arg3[%c1_19, %c0_20, %c0_21] : memref<3x128x128xf32, #tpu.memory_space<vmem>>, vector<1x128x128xf32>
    %31 = vector.shape_cast %30 : vector<1x128x128xf32> to vector<128x128xf32>
    %32 = arith.truncf %29 : vector<16x128xf32> to vector<16x128xbf16>
    %33 = arith.extf %32 : vector<16x128xbf16> to vector<16x128xf32>
    %34 = arith.subf %29, %33 : vector<16x128xf32>
    %cst_22 = arith.constant dense<0.000000e+00> : vector<16x128xf32>
    %35 = tpu.matmul %33, %31, %cst_22 {dimension_numbers = #tpu.dot_dimension_numbers<[1], [0], [0], [1], [0, 0, 1, 1], [], []>} : vector<16x128xf32>, vector<128x128xf32>, vector<16x128xf32> -> vector<16x128xf32>
    %cst_23 = arith.constant dense<0.000000e+00> : vector<16x128xf32>
    %36 = tpu.matmul %34, %31, %cst_23 {dimension_numbers = #tpu.dot_dimension_numbers<[1], [0], [0], [1], [0, 0, 1, 1], [], []>} : vector<16x128xf32>, vector<128x128xf32>, vector<16x128xf32> -> vector<16x128xf32>
    %37 = arith.addf %35, %36 : vector<16x128xf32>
    %38 = arith.subf %17, %37 : vector<16x128xf32>
    %c0_24 = arith.constant 0 : index
    %c1_25 = arith.constant 1 : index
    %c0_26 = arith.constant 0 : index
    %c0_27 = arith.constant 0 : index
    %39 = vector.load %arg4[%c0_24, %c1_25, %c0_26, %c0_27] : memref<1x4x16x128xf32, #tpu.memory_space<vmem>>, vector<1x1x16x128xf32>
    %40 = vector.shape_cast %39 : vector<1x1x16x128xf32> to vector<16x128xf32>
    %41 = vector.shape_cast %38 : vector<16x128xf32> to vector<1x1x16x128xf32>
    tpu.vector_store %arg4[%c0_24, %c1_25, %c0_26, %c0_27], %41 {strides = array<i32>} : memref<1x4x16x128xf32, #tpu.memory_space<vmem>>, vector<1x1x16x128xf32>,
    %c2 = arith.constant 2 : index
    %c0_28 = arith.constant 0 : index
    %c0_29 = arith.constant 0 : index
    %42 = vector.load %arg2[%c2, %c0_28, %c0_29] : memref<3x16x16xf32, #tpu.memory_space<vmem>>, vector<1x16x16xf32>
    %43 = vector.shape_cast %42 : vector<1x16x16xf32> to vector<16x16xf32>
    %44 = arith.truncf %37 : vector<16x128xf32> to vector<16x128xbf16>
    %45 = arith.extf %44 : vector<16x128xbf16> to vector<16x128xf32>
    %46 = arith.subf %37, %45 : vector<16x128xf32>
    %cst_30 = arith.constant dense<0.000000e+00> : vector<16x128xf32>
    %47 = tpu.matmul %43, %45, %cst_30 {dimension_numbers = #tpu.dot_dimension_numbers<[1], [0], [0], [1], [0, 0, 1, 1], [], []>} : vector<16x16xf32>, vector<16x128xf32>, vector<16x128xf32> -> vector<16x128xf32>
    %cst_31 = arith.constant dense<0.000000e+00> : vector<16x128xf32>
    %48 = tpu.matmul %43, %46, %cst_31 {dimension_numbers = #tpu.dot_dimension_numbers<[1], [0], [0], [1], [0, 0, 1, 1], [], []>} : vector<16x16xf32>, vector<16x128xf32>, vector<16x128xf32> -> vector<16x128xf32>
    %49 = arith.addf %47, %48 : vector<16x128xf32>
    %c2_32 = arith.constant 2 : index
    %c0_33 = arith.constant 0 : index
    %c0_34 = arith.constant 0 : index
    %50 = vector.load %arg3[%c2_32, %c0_33, %c0_34] : memref<3x128x128xf32, #tpu.memory_space<vmem>>, vector<1x128x128xf32>
    %51 = vector.shape_cast %50 : vector<1x128x128xf32> to vector<128x128xf32>
    %52 = arith.truncf %49 : vector<16x128xf32> to vector<16x128xbf16>
    %53 = arith.extf %52 : vector<16x128xbf16> to vector<16x128xf32>
    %54 = arith.subf %49, %53 : vector<16x128xf32>
    %cst_35 = arith.constant dense<0.000000e+00> : vector<16x128xf32>
    %55 = tpu.matmul %53, %51, %cst_35 {dimension_numbers = #tpu.dot_dimension_numbers<[1], [0], [0], [1], [0, 0, 1, 1], [], []>} : vector<16x128xf32>, vector<128x128xf32>, vector<16x128xf32> -> vector<16x128xf32>
    %cst_36 = arith.constant dense<0.000000e+00> : vector<16x128xf32>
    %56 = tpu.matmul %54, %51, %cst_36 {dimension_numbers = #tpu.dot_dimension_numbers<[1], [0], [0], [1], [0, 0, 1, 1], [], []>} : vector<16x128xf32>, vector<128x128xf32>, vector<16x128xf32> -> vector<16x128xf32>
    %57 = arith.addf %55, %56 : vector<16x128xf32>
    %58 = arith.subf %37, %57 : vector<16x128xf32>
    %c0_37 = arith.constant 0 : index
    %c2_38 = arith.constant 2 : index
    %c0_39 = arith.constant 0 : index
    %c0_40 = arith.constant 0 : index
    %59 = vector.load %arg4[%c0_37, %c2_38, %c0_39, %c0_40] : memref<1x4x16x128xf32, #tpu.memory_space<vmem>>, vector<1x1x16x128xf32>
    %60 = vector.shape_cast %59 : vector<1x1x16x128xf32> to vector<16x128xf32>
    %61 = vector.shape_cast %58 : vector<16x128xf32> to vector<1x1x16x128xf32>
    tpu.vector_store %arg4[%c0_37, %c2_38, %c0_39, %c0_40], %61 {strides = array<i32>} : memref<1x4x16x128xf32, #tpu.memory_space<vmem>>, vector<1x1x16x128xf32>,
    %c0_41 = arith.constant 0 : index
    %c3 = arith.constant 3 : index
    %c0_42 = arith.constant 0 : index
    %c0_43 = arith.constant 0 : index
    %62 = vector.load %arg4[%c0_41, %c3, %c0_42, %c0_43] : memref<1x4x16x128xf32, #tpu.memory_space<vmem>>, vector<1x1x16x128xf32>
    %63 = vector.shape_cast %62 : vector<1x1x16x128xf32> to vector<16x128xf32>
    %64 = vector.shape_cast %57 : vector<16x128xf32> to vector<1x1x16x128xf32>
    tpu.vector_store %arg4[%c0_41, %c3, %c0_42, %c0_43], %64 {strides = array<i32>} : memref<1x4x16x128xf32, #tpu.memory_space<vmem>>, vector<1x1x16x128xf32>,
    return
  }
  func.func @transform_0(%arg0: i32) -> (i32, i32, i32) {
    %c0_i32 = arith.constant 0 : i32
    %c0_i32_0 = arith.constant 0 : i32
    %c0_i32_1 = arith.constant 0 : i32
    return %arg0, %c0_i32, %c0_i32_0 : i32, i32, i32
  }
  func.func @transform_1(%arg0: i32) -> (i32, i32, i32) {
    %c0_i32 = arith.constant 0 : i32
    %c0_i32_0 = arith.constant 0 : i32
    %c0_i32_1 = arith.constant 0 : i32
    %c0_i32_2 = arith.constant 0 : i32
    return %c0_i32, %c0_i32_0, %c0_i32_1 : i32, i32, i32
  }
  func.func @transform_2(%arg0: i32) -> (i32, i32, i32) {
    %c0_i32 = arith.constant 0 : i32
    %c0_i32_0 = arith.constant 0 : i32
    %c0_i32_1 = arith.constant 0 : i32
    %c0_i32_2 = arith.constant 0 : i32
    return %c0_i32, %c0_i32_0, %c0_i32_1 : i32, i32, i32
  }
  func.func @transform_3(%arg0: i32) -> (i32, i32, i32, i32) {
    %c0_i32 = arith.constant 0 : i32
    %c0_i32_0 = arith.constant 0 : i32
    %c0_i32_1 = arith.constant 0 : i32
    %c0_i32_2 = arith.constant 0 : i32
    return %arg0, %c0_i32, %c0_i32_0, %c0_i32_1 : i32, i32, i32, i32
  }
}

</mosaic_0001>

<bundles_post_ra>
// kernel: tpu_custom_call.1
= control target key start
LH: loop header
LB: loop body
LE: loop exit
PB: predicated region body
PF: predicated region fallthrough
CT: control target
= control target key end

     0   :  { %8 = vsyncpa [#allocation3], 0  ;;  %s2558_s0 = inlined_call_operand.hbm [shape: f32[2,16,128], index: 0, kind: input, shape index: {}]   ;;  %s2559_s1 = inlined_call_operand.hbm [shape: f32[3,16,16], index: 1, kind: input, shape index: {}]   ;;  %s2560_s2 = inlined_call_operand.hbm [shape: f32[3,128,128], index: 2, kind: input, shape index: {}]   ;;  %s2561_s3 = inlined_call_operand.hbm [shape: f32[2,4,16,128], index: 3, kind: output, shape index: {}]  }
   0x1   :  { %10 = vsyncpa [#allocation3 + $0x1], 0 }
   0x2   :  { %11 = vsyncpa [#allocation6], 0 }
   0x3   :  { %12 = vsyncpa [#allocation4], 0 }
   0x4   :  { %14 = vsyncpa [#allocation4 + $0x1], 0  ;;  %s2257_s12 = smov 0   ;;  %s2259_s13 = smov 0  }
   0x5   :  { %s2261_s14 = smov 0   ;;  %s2263_s15 = smov 0  }
   0x6 LB: > { %s2278_s16 = sadd.s32 4294967295, %s2227_s15   ;;  %s1350_s17 = sadd.s32 4294967294, %s2227_s15   ;;  %s2227_s15 = sphi %s2263_s15, %s2581_s15   ;;  %s2223_s14 = sphi %s2261_s14, %s2580_s14   ;;  %s2219_s13 = sphi %s2259_s13, %s2579_s13   ;;  %s2215_s12 = sphi %s2257_s12, %s2578_s12  }
   0x7   : > { %p40_p0 = scmp.ne.s32.totalorder %s2219_s13, %s2215_s12  ;;  %p2562_p1 = scmp.eq.s32.totalorder %s2278_s16, 0 }
   0x8   : > { %p112_p3 = scmp.eq.s32.totalorder %s1350_s17, 1  ;;  %p1351_p5 = scmp.ge.s32.totalorder %s2227_s15, 1 }
   0x9   : > { %p2287_p4 = por %p2562_p1, %p40_p0  ;;  %p119_p7 = scmp.lt.s32.totalorder %s2227_s15, 3 }
   0xa   : > { %p2292_p6 = por %p112_p3, %p40_p0  ;;  %s2229_s21 = smov [#allocation5]  }
   0xb   : > { %s2565_s18 = scalar_select %p2287_p4, 1, 0 }
   0xc   : > { %s2566_s19 = scalar_select %p2292_p6, 1, 0 }
   0xd   : > { %p2297_p8 = pnand %p1351_p5, %p119_p7  ;;  %s131_s22 = sshll.u32 %s2229_s21, 4  ;;  %s2301_s22 = int_to_ptr.vmem [resolvable:$true] %s131_s22 }
   0xe   : > { %s2230_s24 = smov [#allocation7]   ;;  %s2071_s28 = scalar_lea.hbm %s2559_s1, 768 }
   0xf   : > { %p2012_p9 = pneg %p2297_p8  ;;  %s144_s25 = sshll.u32 %s2230_s24, 4  ;;  %s2312_s25 = int_to_ptr.vmem [resolvable:$true] %s144_s25 }
  0x10   : > { %p2072_p12 = scmp.ne.s32.totalorder %s2559_s1, %s2071_s28  ;;  %p2078_p5 = scmp.lt.u32.totalorder %s2071_s28, %s2559_s1 }
  0x11   : > { %p2308_p11 = pnand %p2012_p9, %p2562_p1 }
  0x13   : > { %p2073_p13 = pneg %p2308_p11 }
  0x15   : > { %p2074_p0 = pnand %p2073_p13, %p2072_p12 }
  0x17   : > { %p2075_p3 = pneg %p2074_p0 }
  0x19   : > { %p2080_p7 = pnand %p2078_p5, %p2075_p3 }
  0x1b   : > { %2083 = shalt.err (!%p2080_p7)
}
  0x1c   : > { %s2084_s6 = scalar_lea.vmem %s2301_s22, 768  ;;  %p2092_p2 = scmp.lt.s32.totalorder %s2301_s22, %s2301_s22 }
  0x1d   : > { %p2085_p9 = scmp.ne.s32.totalorder %s2301_s22, %s2084_s6  ;;  %p2093_p12 = scmp.lt.s32.totalorder %s2084_s6, %s2084_s6 }
  0x1f   : > { %p2087_p10 = pnand %p2085_p9, %p2073_p13  ;;  %p2094_p0 = por %p2093_p12, %p2092_p2 }
  0x21   : > { %p2088_p1 = pneg %p2087_p10 }
  0x23   : > { %p2095_p6 = pnand %p2094_p0, %p2088_p1 }
  0x25   : > { %2098 = shalt.err (!%p2095_p6)
}
  0x26   : > { %s2231_s7 = smov 128   ;;  %s2232_s8 = smov 8  }
  0x27   : > { %2015 = dma.hbm_to_vmem [thread:$0]  (!%p2308_p11), %s2559_s1, 768, %s2301_s22, [#allocation6], %s2231_s7, %s2231_s7, %s2232_s8  }
  0x28   : > { %s2099_s21 = scalar_lea.hbm %s2560_s2, 6144 }
  0x29   : > { %p2100_p1 = scmp.ne.s32.totalorder %s2560_s2, %s2099_s21  ;;  %p2106_p10 = scmp.lt.u32.totalorder %s2099_s21, %s2560_s2 }
  0x2b   : > { %p2102_p2 = pnand %p2100_p1, %p2073_p13 }
  0x2d   : > { %p2103_p6 = pneg %p2102_p2 }
  0x2f   : > { %p2108_p3 = pnand %p2106_p10, %p2103_p6 }
  0x31   : > { %2111 = shalt.err (!%p2108_p3)
}
  0x32   : > { %s2112_s22 = scalar_lea.vmem %s2312_s25, 6144  ;;  %p2120_p12 = scmp.lt.s32.totalorder %s2312_s25, %s2312_s25 }
  0x33   : > { %p2113_p5 = scmp.ne.s32.totalorder %s2312_s25, %s2112_s22  ;;  %p2121_p0 = scmp.lt.s32.totalorder %s2112_s22, %s2112_s22 }
  0x35   : > { %p2115_p7 = pnand %p2113_p5, %p2073_p13  ;;  %p2122_p1 = por %p2121_p0, %p2120_p12 }
  0x37   : > { %p2116_p9 = pneg %p2115_p7 }
  0x39   : > { %p2123_p2 = pnand %p2122_p1, %p2116_p9 }
  0x3b   : > { %2126 = shalt.err (!%p2123_p2)
}
  0x3c   : > { %2018 = dma.hbm_to_vmem [thread:$0]  (!%p2308_p11), %s2560_s2, 6144, %s2312_s25, [#allocation6], %s2231_s7, %s2231_s7, %s2232_s8  }
  0x3d   : > { %s2373_s23 = sadd.s32 1, %s2227_s15   ;;  %s27_s4 = sadd.s32 1, %s2223_s14 }
  0x3e   : > { %s24_s5 = ssub.s32 %s2227_s15, %s2373_s23  ;;  %p34_p13 = scmp.ne.s32.totalorder %s2223_s14, %s2219_s13 }
  0x3f   : > { %p25_p6 = scmp.eq.s32.totalorder %s24_s5, 0  ;;  %p35_p10 = scmp.eq.s32.totalorder %s2227_s15, 0 }
  0x40   : > { %p2569_p3 = scmp.eq.s32.totalorder %s2278_s16, 1  ;;  %p2029_p7 = scmp.lt.s32.totalorder %s2227_s15, 2 }
  0x41   : > { %s2389_s9 = scalar_select %p25_p6, %s2223_s14, %s27_s4  }
  0x42   : > { %p2383_p5 = por %p2569_p3, %p34_p13  ;;  %p36_p9 = por %p35_p10, %p34_p13 }
  0x43   : > { %s158_s10 = sand.u32 1, %s2223_s14   ;;  %s1386_s25 = sshll.u32 %s2227_s15, 8 }
  0x44   : > { %s2570_s6 = scalar_select %p2383_p5, 1, 0 }
  0x45   : > { %s1355_s11 = sshll.u32 %s158_s10, 4  ;;  %s2396_s24 = scalar_lea.hbm %s2558_s0, %s1386_s25 }
  0x46   : > { %s162_s26 = scalar_lea.vmem [#allocation2], %s1355_s11  ;;  %p2400_p11 = pnand %p2029_p7, %p36_p9 }
  0x47   : > { %s169_s27 = sshll.u32 %s162_s26, 4  ;;  %s2404_s22 = scalar_lea.sflag [#allocation3], %s158_s10  ;;  %s2398_s27 = int_to_ptr.vmem [resolvable:$true] %s169_s27 }
  0x48   : > { %s2127_s29 = scalar_lea.hbm %s2396_s24, 256  ;;  %p2129_p0 = pneg %p2400_p11 }
  0x49   : > { %p2128_p12 = scmp.ne.s32.totalorder %s2396_s24, %s2127_s29  ;;  %s2132_s5 = scalar_lea.hbm %s2558_s0, 512 }
  0x4a   : > { %p2133_p13 = scmp.lt.u32.totalorder %s2396_s24, %s2558_s0  ;;  %p2134_p6 = scmp.lt.u32.totalorder %s2132_s5, %s2127_s29 }
  0x4b   : > { %p2130_p1 = pnand %p2129_p0, %p2128_p12  ;;  %p2136_p3 = scmp.lt.u32.totalorder %s2127_s29, %s2396_s24 }
  0x4c   : > { %p2135_p10 = por %p2134_p6, %p2133_p13 }
  0x4d   : > { %p2131_p2 = pneg %p2130_p1 }
  0x4e   : > { %p2137_p7 = por %p2136_p3, %p2135_p10 }
  0x50   : > { %p2138_p9 = pnand %p2137_p7, %p2131_p2 }
  0x52   : > { %2141 = shalt.err (!%p2138_p9)
}
  0x53   : > { %s2142_s10 = scalar_lea.vmem %s2398_s27, 256  ;;  %s2233_s17 = smov [#allocation2]  }
  0x54   : > { %p2143_p12 = scmp.ne.s32.totalorder %s2398_s27, %s2142_s10  ;;  %s2147_s21 = sshll.u32 %s2233_s17, 4  ;;  %s2148_s21 = int_to_ptr.vmem [resolvable:$false] %s2147_s21 }
  0x55   : > { %s2149_s26 = scalar_lea.vmem %s2148_s21, 512  ;;  %p2150_p4 = scmp.lt.s32.totalorder %s2398_s27, %s2148_s21 }
  0x56   : > { %p2145_p1 = pnand %p2143_p12, %p2129_p0  ;;  %p2151_p13 = scmp.lt.s32.totalorder %s2149_s26, %s2142_s10 }
  0x58   : > { %p2146_p5 = pneg %p2145_p1  ;;  %p2152_p6 = por %p2151_p13, %p2150_p4 }
  0x5a   : > { %p2153_p10 = pnand %p2152_p6, %p2146_p5 }
  0x5c   : > { %2156 = shalt.err (!%p2153_p10)
}
  0x5d   : > { %2022 = dma.hbm_to_vmem [thread:$0]  (!%p2400_p11), %s2396_s24, 256, %s2398_s27, %s2404_s22, %s2231_s7, %s2231_s7, %s2232_s8  }
  0x5e   : > { %181 = sbr.rel (%p2297_p8) target bundleno = 1542 (0x606), region = 32  ;;  %s2438_s29 = sand.u32 (!%p2297_p8), 1, %s2219_s13  }
  0x5f   : > { %s1359_s30 = sshll.u32 (!%p2297_p8), %s2438_s29, 4  ;;  %s184_s4 = scalar_lea.sflag (!%p2297_p8), [#allocation3], %s2438_s29 }
  0x60   : > { %s187_s5 = scalar_lea.vmem (!%p2297_p8), [#allocation2], %s1359_s30  ;;  %p2572_p4 = scmp.ne.s32.totalorder (!%p2297_p8), %s2565_s18, 0 }
  0x65   : > { %2202 = dma.done.wait (%p2572_p4), %s184_s4, 256  }
  0x66   : > { %2204 = vsyncadd (%p2572_p4), %s184_s4, 4294967040  ;;  %p2573_p5 = scmp.eq.s32.totalorder %s2278_s16, 0 }
  0x68   : > { %2206 = dma.done.wait (%p2573_p5), [#allocation6], 6912   ;;  %p2574_p11 = pmov %p2573_p5 }
  0x69   : > { %vm227_vm0 = vcmask 130048   ;;  %v2450_v0 = vld [vmem:[%s187_s5] sm:$0xff]  ;;  %v2452_v1 = vld [vmem:[%s187_s5 + $0x8] sm:$0xff]  ;;  %s1362_s18 = sshll.u32 %s2438_s29, 6  ;;  %s1387_s7 = sshll.u32 %s2278_s16, 10 }
  0x6a   : > { %2208 = vsyncadd (%p2574_p11), [#allocation6], 4294960384  ;;  %v220_v2 = vld [vmem:[#allocation5] sm:$0xff]  ;;  %v222_v3 = vpack.c.bf16 %v2452_v1, %v2450_v0  ;;  %v384_v4 = vld [vmem:[#allocation7] sm:$0xff]  ;;  %s2474_s20 = scalar_lea.vmem [#allocation8], %s1362_s18  ;;  %s2508_s28 = scalar_lea.hbm %s2561_s3, %s1387_s7 }
  0x6b   : > { %1531 = vmatprep.mubr.msk.f32.mxu0 %vm227_vm0, %v220_v2  ;;  %1524 = vmatprep.mubr.msk.f32.mxu1 %vm227_vm0, %v220_v2  ;;  %v385_v5 = vld [vmem:[#allocation7 + $0x8] sm:$0xff]  ;;  %v221_v9 = vld [vmem:[#allocation5 + $0x8] sm:$0xff]  ;;  %v386_v10 = vld [vmem:[#allocation7 + $0x10] sm:$0xff]  ;;  %s1258_s8 = sshll.u32 %s2474_s20, 4  ;;  %s1245_s16 = scalar_lea.sflag [#allocation4], %s2438_s29  ;;  %s2510_s8 = int_to_ptr.vmem [resolvable:$true] %s1258_s8 }
  0x6c   : > { %1777 = vmatprep.subr.bf16.mxu0 %v222_v3  ;;  %v223_v6 = vunpack.c.l.bf16 %v222_v3  ;;  %v224_v7 = vunpack.c.h.bf16 %v222_v3  ;;  %v1780_v8 = vpack.c.bf16 %v385_v5, %v384_v4  ;;  %v387_v11 = vld [vmem:[#allocation7 + $0x18] sm:$0xff]  ;;  %v388_v16 = vld [vmem:[#allocation7 + $0x20] sm:$0xff]  ;;  %v389_v17 = vld [vmem:[#allocation7 + $0x28] sm:$0xff]  ;;  %s2157_s22 = scalar_lea.vmem %s2510_s8, 1024  ;;  %p2575_p0 = scmp.ne.s32.totalorder %s2570_s6, 0 }
  0x6d   : > { %1779 = vmatpush3.bf16.msra.mxu0 %v222_v3  ;;  %v1784_v15 = vpack.c.bf16 %v387_v11, %v386_v10  ;;  %v1788_v18 = vpack.c.bf16 %v389_v17, %v388_v16  ;;  %v390_v19 = vld [vmem:[#allocation7 + $0x30] sm:$0xff]  ;;  %v391_v20 = vld [vmem:[#allocation7 + $0x38] sm:$0xff]  ;;  %v392_v22 = vld [vmem:[#allocation7 + $0x40] sm:$0xff]  ;;  %p2158_p8 = scmp.ne.s32.totalorder %s2510_s8, %s2157_s22  ;;  %s2234_s11 = smov [#allocation8]  }
  0x6e   : > { %v225_v12 = vsub.f32 %v2450_v0, %v223_v6  ;;  %v226_v13 = vsub.f32 %v2452_v1, %v224_v7  ;;  %1781 = vmatprep.subr.bf16.mxu0 %v1780_v8  ;;  %v1792_v21 = vpack.c.bf16 %v391_v20, %v390_v19  ;;  %v393_v23 = vld [vmem:[#allocation7 + $0x48] sm:$0xff]  ;;  %v394_v25 = vld [vmem:[#allocation7 + $0x50] sm:$0xff]  ;;  %v395_v26 = vld [vmem:[#allocation7 + $0x58] sm:$0xff]  ;;  %s2161_s25 = sshll.u32 %s2234_s11, 4  ;;  %s2162_s25 = int_to_ptr.vmem [resolvable:$false] %s2161_s25 }
  0x6f   : > { %v1796_v24 = vpack.c.bf16 %v393_v23, %v392_v22  ;;  %v1800_v27 = vpack.c.bf16 %v395_v26, %v394_v25  ;;  %v396_v28 = vld [vmem:[#allocation7 + $0x60] sm:$0xff]  ;;  %v397_v29 = vld [vmem:[#allocation7 + $0x68] sm:$0xff]  ;;  %v398_v31 = vld [vmem:[#allocation7 + $0x70] sm:$0xff]  ;;  %p2159_p2 = pnand %p2158_p8, %p2575_p0  ;;  %s2163_s10 = scalar_lea.vmem %s2162_s25, 2048 }
  0x70   : > { %v1772_v14 = vpack.c.bf16 %v226_v13, %v225_v12  ;;  %1532 = vmatmul.mubr.msk.f32.vlgmr.msra.gmra.mrb[0].mxu0 %vm227_vm0, %v221_v9  ;;  %v1804_v30 = vpack.c.bf16 %v397_v29, %v396_v28  ;;  %v399_v32 = vld [vmem:[#allocation7 + $0x78] sm:$0xff]  ;;  %v560_v45 = vld [vmem:[#allocation5 + $0x10] sm:$0xff]  ;;  %v725_v61 = vld [vmem:[#allocation7 + $0x88] sm:$0xff]  ;;  %p2164_p7 = scmp.lt.s32.totalorder %s2510_s8, %s2162_s25  ;;  %p2165_p9 = scmp.lt.s32.totalorder %s2163_s10, %s2157_s22 }
  0x71   : > { %1783 = vmatpush3.bf16.msra.mxu0 %v1780_v8  ;;  %v1808_v33 = vpack.c.bf16 %v399_v32, %v398_v31  ;;  %v724_v60 = vld [vmem:[#allocation7 + $0x80] sm:$0xff]  ;;  %v561_v62 = vld [vmem:[#allocation5 + $0x18] sm:$0xff]  ;;  %v730_v6 = vld [vmem:[#allocation7 + $0xb0] sm:$0xff]  ;;  %p2160_p3 = pneg %p2159_p2 }
  0x72   : > { %1773 = vmatprep.subr.bf16.mxu1 %v1772_v14  ;;  %1785 = vmatprep.subr.bf16.mxu0 %v1784_v15  ;;  %v1852_v63 = vpack.c.bf16 %v725_v61, %v724_v60  ;;  %v728_v3 = vld [vmem:[#allocation7 + $0xa0] sm:$0xff]  ;;  %v729_v4 = vld [vmem:[#allocation7 + $0xa8] sm:$0xff]  ;;  %v731_v7 = vld [vmem:[#allocation7 + $0xb8] sm:$0xff]  ;;  %p2166_p12 = por %p2165_p9, %p2164_p7 }
  0x73   : > { %1775 = vmatpush3.bf16.msra.mxu1 %v1772_v14  ;;  %v1860_v5 = vpack.c.bf16 %v729_v4, %v728_v3  ;;  %v733_v10 = vld [vmem:[#allocation7 + $0xc8] sm:$0xff]  ;;  %v734_v12 = vld [vmem:[#allocation7 + $0xd0] sm:$0xff]  ;;  %v735_v13 = vld [vmem:[#allocation7 + $0xd8] sm:$0xff] }
  0x74   : > { %1813 = vmatprep.subr.bf16.mxu1 %v1780_v8  ;;  %v1872_v14 = vpack.c.bf16 %v735_v13, %v734_v12  ;;  %v737_v16 = vld [vmem:[#allocation7 + $0xe8] sm:$0xff]  ;;  %v739_v19 = vld [vmem:[#allocation7 + $0xf8] sm:$0xff]  ;;  %v901_v28 = vld [vmem:[#allocation5 + $0x20] sm:$0xff]  ;;  %p2167_p1 = pnand %p2166_p12, %p2160_p3 }
  0x75   : > { %1787 = vmatpush3.bf16.msra.mxu0 %v1784_v15  ;;  %v1079_v61 = vld [vmem:[#allocation7 + $0x170] sm:$0xff] }
  0x76   : > { %1525 = vmatmul.mubr.msk.f32.vlgmr.msra.gmra.mrb[0].mxu1 %vm227_vm0, %v221_v9  ;;  %1789 = vmatprep.subr.bf16.mxu0 %v1788_v18  ;;  %v732_v9 = vld [vmem:[#allocation7 + $0xc0] sm:$0xff] }
  0x77   : > { %1815 = vmatpush3.bf16.msra.mxu1 %v1780_v8  ;;  %v1864_v8 = vpack.c.bf16 %v731_v7, %v730_v6  ;;  %v1868_v11 = vpack.c.bf16 %v733_v10, %v732_v9 }
  0x78   : > { %1817 = vmatprep.subr.bf16.mxu1 %v1784_v15 }
  0x79   : > { %1791 = vmatpush3.bf16.msra.mxu0 %v1788_v18 }
  0x7a   : > { %1793 = vmatprep.subr.bf16.mxu0 %v1792_v21 }
  0x7b   : > { %1819 = vmatpush3.bf16.msra.mxu1 %v1784_v15  ;;  %v736_v15 = vld [vmem:[#allocation7 + $0xe0] sm:$0xff] }
  0x7c   : > { %1821 = vmatprep.subr.bf16.mxu1 %v1788_v18  ;;  %v1876_v17 = vpack.c.bf16 %v737_v16, %v736_v15 }
  0x7d   : > { %1795 = vmatpush3.bf16.msra.mxu0 %v1792_v21 }
  0x7e   : > { %1797 = vmatprep.subr.bf16.mxu0 %v1796_v24 }
  0x7f   : > { %1823 = vmatpush3.bf16.msra.mxu1 %v1788_v18  ;;  %v738_v18 = vld [vmem:[#allocation7 + $0xf0] sm:$0xff] }
  0x80   : > { %1825 = vmatprep.subr.bf16.mxu1 %v1792_v21  ;;  %v1880_v20 = vpack.c.bf16 %v739_v19, %v738_v18 }
  0x81   : > { %1799 = vmatpush3.bf16.msra.mxu0 %v1796_v24 }
  0x82   : > { %1801 = vmatprep.subr.bf16.mxu0 %v1800_v27 }
  0x83   : > { %1827 = vmatpush3.bf16.msra.mxu1 %v1792_v21 }
  0x84   : > { %1829 = vmatprep.subr.bf16.mxu1 %v1796_v24 }
  0x85   : > { %1803 = vmatpush3.bf16.msra.mxu0 %v1800_v27 }
  0x86   : > { %1805 = vmatprep.subr.bf16.mxu0 %v1804_v30 }
  0x87   : > { %1831 = vmatpush3.bf16.msra.mxu1 %v1796_v24 }
  0x88   : > { %1833 = vmatprep.subr.bf16.mxu1 %v1800_v27 }
  0x89   : > { %1807 = vmatpush3.bf16.msra.mxu0 %v1804_v30 }
  0x8a   : > { %1809 = vmatprep.subr.bf16.mxu0 %v1808_v33 }
  0x8b   : > { %1835 = vmatpush3.bf16.msra.mxu1 %v1800_v27 }
  0x8c   : > { %1837 = vmatprep.subr.bf16.mxu1 %v1804_v30 }
  0x8d   : > { %1811 = vmatpush3.bf16.msra.mxu0 %v1808_v33 }
  0x8f   : > { %1839 = vmatpush3.bf16.msra.mxu1 %v1804_v30 }
  0x90   : > { %1841 = vmatprep.subr.bf16.mxu1 %v1808_v33 }
  0x93   : > { %1843 = vmatpush3.bf16.msra.mxu1 %v1808_v33 }
 0x143   : > { %v1533_v34 = vpop.f32.mrb[0].mxu0 }
 0x144   : > { %v375_v35 = vpop.f32.mrb[1].mxu0 }
 0x149   : > { %v1526_v36 = vpop.f32.mrb[0].mxu1 }
 0x14a   : > { %v381_v37 = vadd.f32 %v1533_v34, %v1526_v36  ;;  %v300_v38 = vpop.f32.mrb[1].mxu1 }
 0x14b   : > { %v376_v39 = vadd.f32 %v375_v35, %v300_v38 }
 0x14d   : > { %v400_v40 = vpack.c.bf16 %v381_v37, %v376_v39 }
 0x14f   : > { %v401_v41 = vunpack.c.l.bf16 %v400_v40  ;;  %v402_v42 = vunpack.c.h.bf16 %v400_v40  ;;  %v1066_v40 = vld [vmem:[#allocation7 + $0x108] sm:$0xff] }
 0x151   : > { %v403_v43 = vsub.f32 %v376_v39, %v401_v41  ;;  %v404_v44 = vsub.f32 %v381_v37, %v402_v42  ;;  %1601 = vmatprep.mubr.f32.mxu1 %v401_v41  ;;  %v1065_v39 = vld [vmem:[#allocation7 + $0x100] sm:$0xff]  ;;  %v902_v41 = vld [vmem:[#allocation5 + $0x28] sm:$0xff] }
 0x152   : > { %1602 = vmatmul.mubr.f32.vlgmr.msra.gmra.mrb[2].mxu1 %v402_v42  ;;  %v1924_v42 = vpack.c.bf16 %v1066_v40, %v1065_v39 }
 0x153   : > { %1566 = vmatprep.mubr.f32.mxu0 %v403_v43  ;;  %1692 = vmatprep.mubr.msk.f32.mxu1 %vm227_vm0, %v901_v28  ;;  %v1067_v43 = vld [vmem:[#allocation7 + $0x110] sm:$0xff] }
 0x154   : > { %1567 = vmatmul.mubr.f32.vlgmr.msra.gmra.mrb[2].mxu0 %v404_v44  ;;  %v1068_v44 = vld [vmem:[#allocation7 + $0x118] sm:$0xff] }
 0x155   : > { %1608 = vmatprep.mubr.msk.f32.mxu0 %vm227_vm0, %v560_v45 }
 0x225   : > { %v1603_v46 = vpop.f32.mrb[2].mxu1 }
 0x226   : > { %v546_v47 = vpop.f32.mrb[3].mxu1 }
 0x227   : > { %v1568_v48 = vpop.f32.mrb[2].mxu0 }
 0x228   : > { %v2464_v49 = vadd.f32 %v1603_v46, %v1568_v48  ;;  %v471_v50 = vpop.f32.mrb[3].mxu0  ;;  %v1069_v46 = vld [vmem:[#allocation7 + $0x120] sm:$0xff] }
 0x229   : > { %v2466_v51 = vadd.f32 %v546_v47, %v471_v50  ;;  %v1070_v47 = vld [vmem:[#allocation7 + $0x128] sm:$0xff]  ;;  %v1072_v50 = vld [vmem:[#allocation7 + $0x138] sm:$0xff] }
 0x22a   : > { %v556_v52 = vsub.f32 %v2452_v1, %v2464_v49  ;;  %v727_v1 = vld [vmem:[#allocation7 + $0x98] sm:$0xff]  ;;  %v1932_v48 = vpack.c.bf16 %v1070_v47, %v1069_v46 }
 0x22b   : > { %v555_v53 = vsub.f32 %v2450_v0, %v2466_v51  ;;  %v562_v54 = vpack.c.bf16 %v2464_v49, %v2466_v51  ;;  %v726_v0 = vld [vmem:[#allocation7 + $0x90] sm:$0xff] }
 0x22c   : > { %558 = vst [vmem:[%s2474_s20 + $0x8] sm:$0xff] %v556_v52  ;;  %v1856_v2 = vpack.c.bf16 %v727_v1, %v726_v0  ;;  %v1073_v52 = vld [vmem:[#allocation7 + $0x140] sm:$0xff] }
 0x22d   : > { %557 = vst [vmem:[%s2474_s20] sm:$0xff] %v555_v53  ;;  %v563_v55 = vunpack.c.l.bf16 %v562_v54  ;;  %v564_v56 = vunpack.c.h.bf16 %v562_v54  ;;  %v1074_v53 = vld [vmem:[#allocation7 + $0x148] sm:$0xff] }
 0x22f   : > { %v565_v57 = vsub.f32 %v2466_v51, %v563_v55  ;;  %v566_v58 = vsub.f32 %v2464_v49, %v564_v56  ;;  %v1075_v55 = vld [vmem:[#allocation7 + $0x150] sm:$0xff]  ;;  %v1076_v56 = vld [vmem:[#allocation7 + $0x158] sm:$0xff] }
 0x231   : > { %v1844_v59 = vpack.c.bf16 %v566_v58, %v565_v57  ;;  %v1944_v57 = vpack.c.bf16 %v1076_v56, %v1075_v55  ;;  %v1077_v58 = vld [vmem:[#allocation7 + $0x160] sm:$0xff] }
 0x233   : > { %1845 = vmatprep.subr.bf16.mxu0 %v1844_v59 }
 0x234   : > { %1847 = vmatpush3.bf16.msra.mxu0 %v1844_v59  ;;  %v1078_v59 = vld [vmem:[#allocation7 + $0x168] sm:$0xff] }
 0x235   : > { %1849 = vmatprep.subr.bf16.mxu0 %v562_v54  ;;  %v1948_v60 = vpack.c.bf16 %v1078_v59, %v1077_v58 }
 0x237   : > { %1609 = vmatmul.mubr.msk.f32.vlgmr.msra.gmra.mrb[4].mxu0 %vm227_vm0, %v561_v62 }
 0x238   : > { %1851 = vmatpush3.bf16.msra.mxu0 %v562_v54  ;;  %1615 = vmatprep.mubr.msk.f32.mxu0 %vm227_vm0, %v560_v45  ;;  %v1928_v45 = vpack.c.bf16 %v1068_v44, %v1067_v43  ;;  %v1940_v54 = vpack.c.bf16 %v1074_v53, %v1073_v52 }
 0x239   : > { %1853 = vmatprep.subr.bf16.mxu0 %v1852_v63 }
 0x23f   : > { %1616 = vmatmul.mubr.msk.f32.vlgmr.msra.gmra.mrb[4].mxu0 %vm227_vm0, %v561_v62  ;;  %v1080_v62 = vld [vmem:[#allocation7 + $0x178] sm:$0xff] }
 0x240   : > { %1855 = vmatpush3.bf16.msra.mxu0 %v1852_v63 }
 0x241   : > { %1857 = vmatprep.subr.bf16.mxu0 %v1856_v2 }
 0x244   : > { %1859 = vmatpush3.bf16.msra.mxu0 %v1856_v2 }
 0x245   : > { %1861 = vmatprep.subr.bf16.mxu0 %v1860_v5 }
 0x248   : > { %1863 = vmatpush3.bf16.msra.mxu0 %v1860_v5 }
 0x249   : > { %1865 = vmatprep.subr.bf16.mxu0 %v1864_v8 }
 0x24c   : > { %1867 = vmatpush3.bf16.msra.mxu0 %v1864_v8 }
 0x24d   : > { %1869 = vmatprep.subr.bf16.mxu0 %v1868_v11 }
 0x250   : > { %1871 = vmatpush3.bf16.msra.mxu0 %v1868_v11 }
 0x251   : > { %1873 = vmatprep.subr.bf16.mxu0 %v1872_v14 }
 0x254   : > { %1875 = vmatpush3.bf16.msra.mxu0 %v1872_v14 }
 0x255   : > { %1877 = vmatprep.subr.bf16.mxu0 %v1876_v17 }
 0x258   : > { %1879 = vmatpush3.bf16.msra.mxu0 %v1876_v17 }
 0x259   : > { %1881 = vmatprep.subr.bf16.mxu0 %v1880_v20 }
 0x25c   : > { %1883 = vmatpush3.bf16.msra.mxu0 %v1880_v20 }
 0x25d   : > { %1885 = vmatprep.subr.bf16.mxu0 %v1852_v63 }
 0x312   : > { %v1617_v21 = vpop.f32.mrb[4].mxu0 }
 0x313   : > { %v714_v22 = vpop.f32.mrb[5].mxu0 }
 0x314   : > { %v740_v23 = vpack.c.bf16 %v1617_v21, %v714_v22 }
 0x316   : > { %v741_v24 = vunpack.c.l.bf16 %v740_v23  ;;  %v742_v25 = vunpack.c.h.bf16 %v740_v23 }
 0x318   : > { %v743_v26 = vsub.f32 %v714_v22, %v741_v24  ;;  %v744_v27 = vsub.f32 %v1617_v21, %v742_v25 }
 0x31a   : > { %1650 = vmatprep.mubr.f32.mxu0 %v743_v26 }
 0x31b   : > { %1651 = vmatmul.mubr.f32.vlgmr.msra.gmra.mrb[6].mxu0 %v744_v27 }
 0x31c   : > { %1887 = vmatpush3.bf16.msra.mxu0 %v1852_v63  ;;  %1685 = vmatprep.mubr.f32.mxu0 %v741_v24  ;;  %v1952_v63 = vpack.c.bf16 %v1080_v62, %v1079_v61 }
 0x31d   : > { %1889 = vmatprep.subr.bf16.mxu0 %v1856_v2 }
 0x320   : > { %1891 = vmatpush3.bf16.msra.mxu0 %v1856_v2 }
 0x321   : > { %1893 = vmatprep.subr.bf16.mxu0 %v1860_v5 }
 0x324   : > { %1895 = vmatpush3.bf16.msra.mxu0 %v1860_v5 }
 0x325   : > { %1897 = vmatprep.subr.bf16.mxu0 %v1864_v8 }
 0x328   : > { %1899 = vmatpush3.bf16.msra.mxu0 %v1864_v8 }
 0x329   : > { %1901 = vmatprep.subr.bf16.mxu0 %v1868_v11 }
 0x32c   : > { %1903 = vmatpush3.bf16.msra.mxu0 %v1868_v11 }
 0x32d   : > { %1905 = vmatprep.subr.bf16.mxu0 %v1872_v14 }
 0x330   : > { %1907 = vmatpush3.bf16.msra.mxu0 %v1872_v14 }
 0x331   : > { %1909 = vmatprep.subr.bf16.mxu0 %v1876_v17 }
 0x334   : > { %1911 = vmatpush3.bf16.msra.mxu0 %v1876_v17 }
 0x335   : > { %1913 = vmatprep.subr.bf16.mxu0 %v1880_v20 }
 0x338   : > { %1915 = vmatpush3.bf16.msra.mxu0 %v1880_v20 }
 0x33b   : > { %1686 = vmatmul.mubr.f32.vlgmr.msra.gmra.mrb[6].mxu0 %v742_v25 }
 0x40e   : > { %v2484_v29 = vpop.f32.mrb[6].mxu0 }
 0x40f   : > { %v896_v30 = vsub.f32 %v2464_v49, %v2484_v29  ;;  %v2488_v31 = vpop.f32.mrb[7].mxu0  ;;  %v1071_v49 = vld [vmem:[#allocation7 + $0x130] sm:$0xff] }
 0x410   : > { %v895_v32 = vsub.f32 %v2466_v51, %v2488_v31  ;;  %v903_v33 = vpack.c.bf16 %v2484_v29, %v2488_v31  ;;  %v1936_v51 = vpack.c.bf16 %v1072_v50, %v1071_v49 }
 0x411   : > { %1372 = vst [vmem:[%s2474_s20 + $0x18] sm:$0xff] %v896_v30 }
 0x412   : > { %1371 = vst [vmem:[%s2474_s20 + $0x10] sm:$0xff] %v895_v32  ;;  %v904_v34 = vunpack.c.l.bf16 %v903_v33  ;;  %v905_v35 = vunpack.c.h.bf16 %v903_v33 }
 0x414   : > { %v906_v36 = vsub.f32 %v2488_v31, %v904_v34  ;;  %v907_v37 = vsub.f32 %v2484_v29, %v905_v35 }
 0x416   : > { %v1916_v38 = vpack.c.bf16 %v907_v37, %v906_v36 }
 0x418   : > { %1917 = vmatprep.subr.bf16.mxu1 %v1916_v38 }
 0x419   : > { %1919 = vmatpush3.bf16.msra.mxu1 %v1916_v38 }
 0x41a   : > { %1921 = vmatprep.subr.bf16.mxu1 %v903_v33 }
 0x41c   : > { %1693 = vmatmul.mubr.msk.f32.vlgmr.msra.gmra.mrb[4].mxu1 %vm227_vm0, %v902_v41 }
 0x41d   : > { %1923 = vmatpush3.bf16.msra.mxu1 %v903_v33  ;;  %1699 = vmatprep.mubr.msk.f32.mxu1 %vm227_vm0, %v901_v28 }
 0x41e   : > { %1925 = vmatprep.subr.bf16.mxu1 %v1924_v42 }
 0x424   : > { %1700 = vmatmul.mubr.msk.f32.vlgmr.msra.gmra.mrb[4].mxu1 %vm227_vm0, %v902_v41 }
 0x425   : > { %1927 = vmatpush3.bf16.msra.mxu1 %v1924_v42 }
 0x426   : > { %1929 = vmatprep.subr.bf16.mxu1 %v1928_v45 }
 0x429   : > { %1931 = vmatpush3.bf16.msra.mxu1 %v1928_v45 }
 0x42a   : > { %1933 = vmatprep.subr.bf16.mxu1 %v1932_v48 }
 0x42d   : > { %1935 = vmatpush3.bf16.msra.mxu1 %v1932_v48 }
 0x42e   : > { %1937 = vmatprep.subr.bf16.mxu1 %v1936_v51 }
 0x431   : > { %1939 = vmatpush3.bf16.msra.mxu1 %v1936_v51 }
 0x432   : > { %1941 = vmatprep.subr.bf16.mxu1 %v1940_v54 }
 0x435   : > { %1943 = vmatpush3.bf16.msra.mxu1 %v1940_v54 }
 0x436   : > { %1945 = vmatprep.subr.bf16.mxu1 %v1944_v57 }
 0x439   : > { %1947 = vmatpush3.bf16.msra.mxu1 %v1944_v57 }
 0x43a   : > { %1949 = vmatprep.subr.bf16.mxu1 %v1948_v60 }
 0x43d   : > { %1951 = vmatpush3.bf16.msra.mxu1 %v1948_v60 }
 0x43e   : > { %1953 = vmatprep.subr.bf16.mxu1 %v1952_v63 }
 0x441   : > { %1955 = vmatpush3.bf16.msra.mxu1 %v1952_v63 }
 0x442   : > { %1957 = vmatprep.subr.bf16.mxu1 %v1924_v42 }
 0x4f7   : > { %v1701_v0 = vpop.f32.mrb[4].mxu1 }
 0x4f8   : > { %v1055_v1 = vpop.f32.mrb[5].mxu1 }
 0x4f9   : > { %v1081_v2 = vpack.c.bf16 %v1701_v0, %v1055_v1 }
 0x4fb   : > { %v1082_v3 = vunpack.c.l.bf16 %v1081_v2  ;;  %v1083_v4 = vunpack.c.h.bf16 %v1081_v2 }
 0x4fd   : > { %v1084_v5 = vsub.f32 %v1055_v1, %v1082_v3  ;;  %v1085_v6 = vsub.f32 %v1701_v0, %v1083_v4 }
 0x4ff   : > { %1734 = vmatprep.mubr.f32.mxu1 %v1084_v5 }
 0x500   : > { %1735 = vmatmul.mubr.f32.vlgmr.msra.gmra.mrb[6].mxu1 %v1085_v6 }
 0x501   : > { %1959 = vmatpush3.bf16.msra.mxu1 %v1924_v42  ;;  %1769 = vmatprep.mubr.f32.mxu1 %v1082_v3 }
 0x502   : > { %1961 = vmatprep.subr.bf16.mxu1 %v1928_v45 }
 0x505   : > { %1963 = vmatpush3.bf16.msra.mxu1 %v1928_v45 }
 0x506   : > { %1965 = vmatprep.subr.bf16.mxu1 %v1932_v48 }
 0x509   : > { %1967 = vmatpush3.bf16.msra.mxu1 %v1932_v48 }
 0x50a   : > { %1969 = vmatprep.subr.bf16.mxu1 %v1936_v51 }
 0x50d   : > { %1971 = vmatpush3.bf16.msra.mxu1 %v1936_v51 }
 0x50e   : > { %1973 = vmatprep.subr.bf16.mxu1 %v1940_v54 }
 0x511   : > { %1975 = vmatpush3.bf16.msra.mxu1 %v1940_v54 }
 0x512   : > { %1977 = vmatprep.subr.bf16.mxu1 %v1944_v57 }
 0x515   : > { %1979 = vmatpush3.bf16.msra.mxu1 %v1944_v57 }
 0x516   : > { %1981 = vmatprep.subr.bf16.mxu1 %v1948_v60 }
 0x519   : > { %1983 = vmatpush3.bf16.msra.mxu1 %v1948_v60 }
 0x51a   : > { %1985 = vmatprep.subr.bf16.mxu1 %v1952_v63 }
 0x51d   : > { %1987 = vmatpush3.bf16.msra.mxu1 %v1952_v63 }
 0x520   : > { %1770 = vmatmul.mubr.f32.vlgmr.msra.gmra.mrb[6].mxu1 %v1083_v4 }
 0x5f3   : > { %v1771_v7 = vpop.f32.mrb[6].mxu1 }
 0x5f4   : > { %v1237_v8 = vsub.f32 %v2484_v29, %v1771_v7  ;;  %1380 = vst [vmem:[%s2474_s20 + $0x38] sm:$0xff] %v1771_v7  ;;  %v1227_v9 = vpop.f32.mrb[7].mxu1 }
 0x5f5   : > { %v1236_v10 = vsub.f32 %v2488_v31, %v1227_v9  ;;  %1379 = vst [vmem:[%s2474_s20 + $0x30] sm:$0xff] %v1227_v9 }
 0x5f6   : > { %1378 = vst [vmem:[%s2474_s20 + $0x28] sm:$0xff] %v1237_v8 }
 0x5f7   : > { %1377 = vst [vmem:[%s2474_s20 + $0x20] sm:$0xff] %v1236_v10 }
 0x5f8   : > { %2170 = shalt.err (!%p2167_p1)
}
 0x5f9   : > { %s2171_s17 = scalar_lea.hbm %s2508_s28, 1024  ;;  %s2175_s30 = scalar_lea.hbm %s2561_s3, 2048 }
 0x5fa   : > { %p2172_p13 = scmp.ne.s32.totalorder %s2508_s28, %s2171_s17  ;;  %p2176_p4 = scmp.lt.u32.totalorder %s2508_s28, %s2561_s3 }
 0x5fb   : > { %p2177_p5 = scmp.lt.u32.totalorder %s2175_s30, %s2171_s17  ;;  %p2179_p8 = scmp.lt.u32.totalorder %s2171_s17, %s2508_s28 }
 0x5fc   : > { %p2173_p6 = pnand %p2172_p13, %p2575_p0 }
 0x5fd   : > { %p2178_p11 = por %p2177_p5, %p2176_p4 }
 0x5fe   : > { %p2174_p10 = pneg %p2173_p6 }
 0x5ff   : > { %p2180_p2 = por %p2179_p8, %p2178_p11 }
 0x601   : > { %p2181_p3 = pnand %p2180_p2, %p2174_p10 }
 0x603   : > { %2184 = shalt.err (!%p2181_p3)
}
 0x604   : > { %s2235_s18 = smov 128   ;;  %s2236_s20 = smov 8  }
 0x605   : > { %2010 = dma.vmem_to_hbm [thread:$0]  (%p2575_p0), %s2510_s8, 1024, %s2508_s28, %s1245_s16, %s2235_s18, %s2235_s18, %s2236_s20  }
 0x606 PF: > { %s1273_s7 = sand.u32 1, %s2215_s12   ;;  %p2576_p7 = scmp.ne.s32.totalorder %s2566_s19, 0 }
 0x607   : > { %p2577_p9 = scmp.ge.s32.totalorder %s2227_s15, 2  ;;  %s1274_s24 = scalar_lea.sflag [#allocation4], %s1273_s7 }
 0x609   : > { %p2024_p12 = pnand %p2577_p9, %p2576_p7 }
 0x60b   : > { %2210 = dma.done.wait (!%p2024_p12), %s1274_s24, 1024  }
 0x60c   : > { %2212 = vsyncadd (!%p2024_p12), %s1274_s24, 4294966272  ;;  %p17_p1 = scmp.ge.s32.totalorder %s2373_s23, 4   ;;  %s2578_s12 = smov %s2219_s13 }
 0x60d   : > { %s2579_s13 = smov %s2223_s14  ;;  %s2580_s14 = smov %s2389_s9 }
 0x60e   : > { %s2581_s15 = smov %s2373_s23  ;;  %19 = sbr.rel (!%p17_p1) target bundleno = 6 (0x6), region = 92 }
 0x615   :  { %1279 = vsyncpa [#allocation3], 1 }
 0x616   :  { %1281 = vsyncpa [#allocation3 + $0x1], 1 }
 0x617   :  { %1282 = vsyncpa [#allocation6], 1 }
 0x618   :  { %1283 = vsyncpa [#allocation4], 1 }
 0x619   :  { %1285 = vsyncpa [#allocation4 + $0x1], 1 }

</bundles_post_ra>
